<compile_context>
chip_gen: v7x
topology: tpu7x:2x2x1
jax: 0.10.0
libtpu: 0.0.40
codegen_flags: <defaults>
</compile_context>

<pallas_src>
import jax
import jax.numpy as jnp
from jax.experimental import pallas as pl
from jax.experimental.pallas import tpu as pltpu


def _round_up(x, m):
    return (x + m - 1) // m * m


def _cdiv(a, b):
    return (a + b - 1) // b


def _sublane(dtype):
    # Minimum second-to-last tile dim: 8 for 4-byte, 16 for 2-byte, 32 for 1-byte.
    return max(8, 32 // jnp.dtype(dtype).itemsize)


def _num_tensorcores_per_chip():
    try:
        kind = jax.devices()[0].device_kind.lower()
        if "v7" in kind:
            return 2
    except Exception:
        pass
    return 1


# ----------------------------------------------------------------------------- kernel
def _swiglu_ffn_kernel(x_ref, w12_ref, w3_ref, o_ref, acc_ref):
    # x_ref   : (tm, d_embed_p)          token tile (constant over k)
    # w12_ref : (d_embed_p, 2*t_ffn)     fused [fc_2 | fc_1] column block k
    # w3_ref  : (t_ffn, d_embed_p)       fc_3 row block k
    # o_ref   : (tm, d_embed_p)          output tile (constant over k)
    # acc_ref : (tm, d_embed_p) f32      VMEM accumulator
    k = pl.program_id(1)

    @pl.when(k == 0)
    def _():
        acc_ref[...] = jnp.zeros_like(acc_ref)

    x = x_ref[...]
    y = jnp.dot(x, w12_ref[...], preferred_element_type=jnp.float32)
    t_ffn = y.shape[-1] // 2
    gate = y[:, :t_ffn]                              # fc_2(h) block (f32)
    up = y[:, t_ffn:]                                # fc_1(h) block (f32)
    hidden = (gate * jax.nn.sigmoid(gate)) * up      # silu(fc_2) * fc_1, f32

    acc_ref[...] += jnp.dot(hidden.astype(w3_ref.dtype), w3_ref[...],
                            preferred_element_type=jnp.float32)

    @pl.when(k == pl.num_programs(1) - 1)
    def _():
        o_ref[...] = acc_ref[...].astype(o_ref.dtype)


# ------------------------------------------------------------------- weight preparation
def prepare_ffn_weights(w1, w2, w3, *, t_ffn=512, param_dtype=jnp.bfloat16):
    """Pad + fuse the SwiGLU weights ONCE (at init / load time, not per forward).

    Returns a dict of device arrays + static geometry consumed by feed_forward().
    """
    d_embed, d_ffn = w1.shape
    assert w2.shape == (d_embed, d_ffn)
    assert w3.shape == (d_ffn, d_embed)

    d_embed_p = _round_up(max(d_embed, 128), 128)
    d_ffn_128 = _round_up(max(d_ffn, 128), 128)
    nk = max(1, _cdiv(d_ffn_128, t_ffn))
    t_ffn_eff = _round_up(_cdiv(d_ffn_128, nk), 128)   # minimal-padding ffn tile
    d_ffn_p = nk * t_ffn_eff

    w1 = w1.astype(param_dtype)
    w2 = w2.astype(param_dtype)
    w3 = w3.astype(param_dtype)

    w1_p = jnp.pad(w1, ((0, d_embed_p - d_embed), (0, d_ffn_p - d_ffn)))
    w2_p = jnp.pad(w2, ((0, d_embed_p - d_embed), (0, d_ffn_p - d_ffn)))
    w3_p = jnp.pad(w3, ((0, d_ffn_p - d_ffn), (0, d_embed_p - d_embed)))

    # Fused column block k is [w2_k | w1_k]  ->  one wide MXU matmul per k step.
    w12 = jnp.concatenate(
        [w2_p.reshape(d_embed_p, nk, t_ffn_eff),
         w1_p.reshape(d_embed_p, nk, t_ffn_eff)],
        axis=-1).reshape(d_embed_p, nk * 2 * t_ffn_eff)

    return dict(w12=w12, w3=w3_p,
                d_embed=d_embed, d_ffn=d_ffn,
                d_embed_p=d_embed_p, d_ffn_p=d_ffn_p,
                t_ffn=t_ffn_eff, nk=nk)


# ------------------------------------------------------------------------- forward pass
def feed_forward(h, params, *, tm=512, vmem_budget_bytes=48 << 20,
                 vmem_limit_bytes=None, split_across_cores=None):
    """SwiGLU FFN forward.  `params` comes from prepare_ffn_weights()."""
    d_embed = params["d_embed"]
    d_embed_p = params["d_embed_p"]
    d_ffn_p = params["d_ffn_p"]
    t_ffn = params["t_ffn"]
    nk = params["nk"]
    w12, w3_p = params["w12"], params["w3"]

    orig_shape = h.shape
    assert orig_shape[-1] == d_embed

    compute_dtype = w12.dtype
    out_dtype = h.dtype
    x = h.reshape(-1, d_embed).astype(compute_dtype)
    n_tok = x.shape[0]

    # ---- token-tile geometry -------------------------------------------------
    sub = _sublane(compute_dtype)
    w_item = jnp.dtype(compute_dtype).itemsize
    o_item = jnp.dtype(out_dtype).itemsize

    # VMEM working-set model (double-buffered pipeline blocks + accumulator +
    # f32 intermediates) -> pick the largest tm that fits the budget.
    fixed_bytes = (2 * d_embed_p * 2 * t_ffn * w_item      # w12 block x2 bufs
                   + 2 * t_ffn * d_embed_p * w_item)        # w3  block x2 bufs
    per_row_bytes = (d_embed_p * (2 * w_item + 2 * o_item + 4)   # x, out, acc
                     + 2 * t_ffn * 4                              # y (f32)
                     + t_ffn * (4 + w_item))                      # hidden + cast

    tm_max = max(sub, min(_round_up(tm, sub), _round_up(n_tok, sub)))
    tm_eff = (tm_max // sub) * sub
    while tm_eff > sub and fixed_bytes + tm_eff * per_row_bytes > vmem_budget_bytes:
        tm_eff -= sub

    # v7x has 2 TensorCores: make sure the "parallel" axis has >= 2 tiles when
    # the token count allows it, so both cores are used on small batches.
    n_cores = (_num_tensorcores_per_chip() if split_across_cores is None
               else (2 if split_across_cores else 1))
    if n_cores >= 2 and _cdiv(_round_up(n_tok, sub), tm_eff) < 2 and n_tok > sub:
        tm_eff = max(sub, _round_up(_cdiv(n_tok, 2), sub))

    n_tok_p = _round_up(max(n_tok, tm_eff), tm_eff)
    ni = n_tok_p // tm_eff

    # ---- pad activations only if needed (weights were padded at init) --------
    if (n_tok_p, d_embed_p) != (n_tok, d_embed):
        x = jnp.pad(x, ((0, n_tok_p - n_tok), (0, d_embed_p - d_embed)))

    # ---- explicit scoped-VMEM limit ------------------------------------------
    est_vmem = fixed_bytes + tm_eff * per_row_bytes
    if vmem_limit_bytes is None:
        vmem_limit_bytes = int(min(max(est_vmem * 5 // 4 + (1 << 20), 32 << 20),
                                   128 << 20))

    # ---- advisory cost estimate (weights are re-read ni times) ---------------
    cost = pl.CostEstimate(
        flops=int(2 * n_tok_p * d_embed_p * 2 * d_ffn_p
                  + 2 * n_tok_p * d_ffn_p * d_embed_p),
        transcendentals=int(n_tok_p * d_ffn_p),
        bytes_accessed=int(w_item * x.size
                           + o_item * n_tok_p * d_embed_p
                           + ni * w_item * (w12.size + w3_p.size)),
    )

    out_p = pl.pallas_call(
        _swiglu_ffn_kernel,
        out_shape=jax.ShapeDtypeStruct((n_tok_p, d_embed_p), out_dtype),
        grid_spec=pltpu.PrefetchScalarGridSpec(
            num_scalar_prefetch=0,
            grid=(ni, nk),                               # reduction axis last
            in_specs=[
                pl.BlockSpec((tm_eff, d_embed_p), lambda i, k: (i, 0)),
                pl.BlockSpec((d_embed_p, 2 * t_ffn), lambda i, k: (0, k)),
                pl.BlockSpec((t_ffn, d_embed_p), lambda i, k: (k, 0)),
            ],
            out_specs=pl.BlockSpec((tm_eff, d_embed_p), lambda i, k: (i, 0)),
            scratch_shapes=[pltpu.VMEM((tm_eff, d_embed_p), jnp.float32)],
        ),
        compiler_params=pltpu.CompilerParams(
            dimension_semantics=("parallel", "arbitrary"),
            vmem_limit_bytes=vmem_limit_bytes),
        cost_estimate=cost,
    )(x, w12, w3_p)

    return out_p[:n_tok, :d_embed].reshape(orig_shape)


# ---------------------------------------------------------------------------- reference
def _reference(h, w1, w2, w3, compute_dtype):
    """Pure-JAX reference mirroring the kernel's dtype handling (bf16 inputs,
    f32 accumulation, silu*up product rounded to compute_dtype before fc_3)."""
    hd = h.astype(compute_dtype)
    gate = jnp.dot(hd, w2.astype(compute_dtype), preferred_element_type=jnp.float32)
    up = jnp.dot(hd, w1.astype(compute_dtype), preferred_element_type=jnp.float32)
    hidden = (jax.nn.silu(gate) * up).astype(compute_dtype)
    out = jnp.dot(hidden, w3.astype(compute_dtype), preferred_element_type=jnp.float32)
    return out.astype(h.dtype)


if __name__ == "__main__":
    # Small shapes consistent with the module's forward (d_ffn default = 680).
    batch, seq = 2, 8
    d_embed, d_ffn = 32, 680

    key = jax.random.PRNGKey(0)
    k_h, k1, k2, k3 = jax.random.split(key, 4)

    h = jax.random.normal(k_h, (batch, seq, d_embed), dtype=jnp.float32)

    # Deterministic init mirroring nn.Linear's U(-1/sqrt(fan_in), 1/sqrt(fan_in)).
    b1 = 1.0 / (d_embed ** 0.5)
    b3 = 1.0 / (d_ffn ** 0.5)
    w1 = jax.random.uniform(k1, (d_embed, d_ffn), jnp.float32, -b1, b1)  # fc_1.weight.T
    w2 = jax.random.uniform(k2, (d_embed, d_ffn), jnp.float32, -b1, b1)  # fc_2.weight.T
    w3 = jax.random.uniform(k3, (d_ffn, d_embed), jnp.float32, -b3, b3)  # fc_3.weight.T

    # Prepare (pad + fuse + cast) weights ONCE, outside the forward path.
    params = prepare_ffn_weights(w1, w2, w3, t_ffn=512, param_dtype=jnp.bfloat16)

    # Production path: bf16 activations into the kernel, f32 accumulation inside.
    h_bf16 = h.astype(jnp.bfloat16)
    out = feed_forward(h_bf16, params)
    out = jax.block_until_ready(out)

    ref = _reference(h_bf16, w1, w2, w3, compute_dtype=jnp.bfloat16)

    assert out.shape == h.shape
    assert jnp.allclose(out.astype(jnp.float32), ref.astype(jnp.float32),
                        atol=2e-2, rtol=2e-2), "mismatch vs reference"

    print("KERNEL_OK")
</pallas_src>

<mosaic_0001>
module attributes {stable_mosaic.version = 11 : i64} {
  func.func @_swiglu_ffn_kernel(%arg0: i32, %arg1: i32, %arg2: memref<16x128xbf16, #tpu.memory_space<vmem>>, %arg3: memref<128x768xbf16, #tpu.memory_space<vmem>>, %arg4: memref<384x128xbf16, #tpu.memory_space<vmem>>, %arg5: memref<16x128xbf16, #tpu.memory_space<vmem>>, %arg6: memref<16x128xf32, #tpu.memory_space<vmem>>) attributes {dimension_semantics = [#tpu.dimension_semantics<parallel>, #tpu.dimension_semantics<arbitrary>], iteration_bounds = array<i64: 1, 2>, scalar_prefetch = 0 : i64, scratch_operands = 1 : i64, tpu.core_type = #tpu.core_type<tc>, window_params = [{transform_indices = @transform_0, window_bounds = array<i64: 16, 128>}, {transform_indices = @transform_1, window_bounds = array<i64: 128, 768>}, {transform_indices = @transform_2, window_bounds = array<i64: 384, 128>}, {transform_indices = @transform_3, window_bounds = array<i64: 16, 128>}]} {
    %c0_i32 = arith.constant 0 : i32
    %0 = arith.cmpi eq, %arg1, %c0_i32 : i32
    %1 = arith.extui %0 : i1 to i32
    %c0_i32_0 = arith.constant 0 : i32
    %2 = arith.cmpi ne, %1, %c0_i32_0 : i32
    scf.if %2 {
      %cst_13 = arith.constant 0.000000e+00 : f32
      %24 = vector.broadcast %cst_13 : f32 to vector<16x128xf32>
      %c0_14 = arith.constant 0 : index
      %c0_15 = arith.constant 0 : index
      %25 = vector.load %arg6[%c0_14, %c0_15] : memref<16x128xf32, #tpu.memory_space<vmem>>, vector<16x128xf32>
      tpu.vector_store %arg6[%c0_14, %c0_15], %24 {strides = array<i32>} : memref<16x128xf32, #tpu.memory_space<vmem>>, vector<16x128xf32>,
    } else {
    }
    %c0 = arith.constant 0 : index
    %c0_1 = arith.constant 0 : index
    %3 = vector.load %arg2[%c0, %c0_1] : memref<16x128xbf16, #tpu.memory_space<vmem>>, vector<16x128xbf16>
    %c0_2 = arith.constant 0 : index
    %c0_3 = arith.constant 0 : index
    %4 = vector.load %arg3[%c0_2, %c0_3] : memref<128x768xbf16, #tpu.memory_space<vmem>>, vector<128x768xbf16>
    %cst = arith.constant dense<0.000000e+00> : vector<16x768xf32>
    %5 = tpu.matmul %3, %4, %cst {dimension_numbers = #tpu.dot_dimension_numbers<[1], [0], [0], [1], [0, 0, 1, 1], [], []>} : vector<16x128xbf16>, vector<128x768xbf16>, vector<16x768xf32> -> vector<16x768xf32>
    %6 = vector.extract_strided_slice %5 {offsets = [0, 0], sizes = [16, 384], strides = [1, 1]} : vector<16x768xf32> to vector<16x384xf32>
    %7 = vector.extract_strided_slice %5 {offsets = [0, 384], sizes = [16, 384], strides = [1, 1]} : vector<16x768xf32> to vector<16x384xf32>
    %8 = arith.negf %6 : vector<16x384xf32>
    %9 = math.exp %8 : vector<16x384xf32>
    %cst_4 = arith.constant 1.000000e+00 : f32
    %10 = vector.broadcast %cst_4 : f32 to vector<16x384xf32>
    %11 = arith.addf %10, %9 : vector<16x384xf32>
    %12 = arith.divf %10, %11 : vector<16x384xf32>
    %13 = arith.mulf %6, %12 : vector<16x384xf32>
    %14 = arith.mulf %13, %7 : vector<16x384xf32>
    %c0_5 = arith.constant 0 : index
    %c0_6 = arith.constant 0 : index
    %15 = vector.load %arg6[%c0_5, %c0_6] : memref<16x128xf32, #tpu.memory_space<vmem>>, vector<16x128xf32>
    %16 = arith.truncf %14 : vector<16x384xf32> to vector<16x384xbf16>
    %c0_7 = arith.constant 0 : index
    %c0_8 = arith.constant 0 : index
    %17 = vector.load %arg4[%c0_7, %c0_8] : memref<384x128xbf16, #tpu.memory_space<vmem>>, vector<384x128xbf16>
    %cst_9 = arith.constant dense<0.000000e+00> : vector<16x128xf32>
    %18 = tpu.matmul %16, %17, %cst_9 {dimension_numbers = #tpu.dot_dimension_numbers<[1], [0], [0], [1], [0, 0, 1, 1], [], []>} : vector<16x384xbf16>, vector<384x128xbf16>, vector<16x128xf32> -> vector<16x128xf32>
    %19 = arith.addf %15, %18 : vector<16x128xf32>
    %c0_10 = arith.constant 0 : index
    %c0_11 = arith.constant 0 : index
    %20 = vector.load %arg6[%c0_10, %c0_11] : memref<16x128xf32, #tpu.memory_space<vmem>>, vector<16x128xf32>
    tpu.vector_store %arg6[%c0_10, %c0_11], %19 {strides = array<i32>} : memref<16x128xf32, #tpu.memory_space<vmem>>, vector<16x128xf32>,
    %c1_i32 = arith.constant 1 : i32
    %21 = arith.cmpi eq, %arg1, %c1_i32 : i32
    %22 = arith.extui %21 : i1 to i32
    %c0_i32_12 = arith.constant 0 : i32
    %23 = arith.cmpi ne, %22, %c0_i32_12 : i32
    scf.if %23 {
      %c0_13 = arith.constant 0 : index
      %c0_14 = arith.constant 0 : index
      %24 = vector.load %arg6[%c0_13, %c0_14] : memref<16x128xf32, #tpu.memory_space<vmem>>, vector<16x128xf32>
      %25 = arith.truncf %24 : vector<16x128xf32> to vector<16x128xbf16>
      %c0_15 = arith.constant 0 : index
      %c0_16 = arith.constant 0 : index
      %26 = vector.load %arg5[%c0_15, %c0_16] : memref<16x128xbf16, #tpu.memory_space<vmem>>, vector<16x128xbf16>
      tpu.vector_store %arg5[%c0_15, %c0_16], %25 {strides = array<i32>} : memref<16x128xbf16, #tpu.memory_space<vmem>>, vector<16x128xbf16>,
    } else {
    }
    return
  }
  func.func @transform_0(%arg0: i32, %arg1: i32) -> (i32, i32) {
    %c0_i32 = arith.constant 0 : i32
    %c0_i32_0 = arith.constant 0 : i32
    return %arg0, %c0_i32 : i32, i32
  }
  func.func @transform_1(%arg0: i32, %arg1: i32) -> (i32, i32) {
    %c0_i32 = arith.constant 0 : i32
    %c0_i32_0 = arith.constant 0 : i32
    return %c0_i32, %arg1 : i32, i32
  }
  func.func @transform_2(%arg0: i32, %arg1: i32) -> (i32, i32) {
    %c0_i32 = arith.constant 0 : i32
    %c0_i32_0 = arith.constant 0 : i32
    return %arg1, %c0_i32 : i32, i32
  }
  func.func @transform_3(%arg0: i32, %arg1: i32) -> (i32, i32) {
    %c0_i32 = arith.constant 0 : i32
    %c0_i32_0 = arith.constant 0 : i32
    return %arg0, %c0_i32 : i32, i32
  }
}

</mosaic_0001>

<bundles_post_ra>
// kernel: tpu_custom_call.1
= control target key start
LH: loop header
LB: loop body
LE: loop exit
PB: predicated region body
PF: predicated region fallthrough
CT: control target
= control target key end

     0   :  { %8 = vsyncpa [#allocation4], 0  ;;  %s2025_s0 = inlined_call_operand.hbm [shape: bf16[16,128], index: 0, kind: input, shape index: {}]   ;;  %s2026_s1 = inlined_call_operand.hbm [shape: bf16[128,1536], index: 1, kind: input, shape index: {}]   ;;  %s2027_s2 = inlined_call_operand.hbm [shape: bf16[768,128], index: 2, kind: input, shape index: {}]   ;;  %s2028_s3 = inlined_call_operand.hbm [shape: bf16[16,128], index: 3, kind: output, shape index: {}]  }
   0x1   :  { %9 = vsyncpa [#allocation7], 0 }
   0x2   :  { %11 = vsyncpa [#allocation7 + $0x1], 0 }
   0x3   :  { %12 = vsyncpa [#allocation5], 0  ;;  %s1722_s12 = smov 0   ;;  %s1724_s13 = smov 0  }
   0x4   :  { %s1726_s14 = smov 0   ;;  %s1728_s15 = smov 0  }
   0x5   :  { %s1730_s16 = smov 0   ;;  %s1732_s17 = smov 0  }
   0x6 LB: > { %s27_s18 = sadd.s32 1, %s1681_s16  ;;  %s63_s19 = sadd.s32 1, %s1673_s14  ;;  %s1685_s17 = sphi %s1732_s17, %s18_s17   ;;  %s1681_s16 = sphi %s1730_s16, %s2050_s16   ;;  %s1677_s15 = sphi %s1728_s15, %s2049_s15   ;;  %s1673_s14 = sphi %s1726_s14, %s2048_s14   ;;  %s1669_s13 = sphi %s1724_s13, %s2047_s13   ;;  %s1665_s12 = sphi %s1722_s12, %s2046_s12  }
   0x7   : > { %p28_p0 = scmp.ge.s32.totalorder %s27_s18, 2  ;;  %p70_p1 = scmp.ne.s32.totalorder %s1673_s14, %s1669_s13 }
   0x8   : > { %p71_p2 = scmp.eq.s32.totalorder %s1685_s17, 0  ;;  %p1327_p4 = scmp.lt.s32.totalorder %s1685_s17, 2 }
   0x9   : > { %s2052_s18 = smov (%p28_p0, %s27_s18), 0  ;;  %s168_s21 = sand.u32 1, %s1685_s17  }
   0xa   : > { %p72_p3 = por %p71_p2, %p70_p1  ;;  %s60_s20 = ssub.s32 %s1681_s16, %s2052_s18 }
   0xb   : > { %p61_p5 = scmp.eq.s32.totalorder %s60_s20, 0  ;;  %s170_s22 = sand.u32 1, %s1673_s14  }
   0xc   : > { %s1239_s23 = smul.u32 384, %s1681_s16  ;;  %p1775_p6 = pnand %p1327_p4, %p72_p3 }
   0xd   : > { %s1766_s24 = scalar_select %p61_p5, %s1673_s14, %s63_s19  }
   0xe   : > { %s1299_s25 = smul.u32 384, %s170_s22  ;;  %s1773_s28 = scalar_lea.hbm %s2026_s1, %s1239_s23 }
   0xf   : > { %s2035_s29 = scalar_select %p1775_p6, 1, 0 }
  0x10   : > { %s172_s30 = scalar_lea.vmem [#allocation6], %s1299_s25  ;;  %s1781_s5 = scalar_lea.sflag [#allocation7], %s168_s21 }
  0x11   : > { %s179_s4 = sshll.u32 %s172_s30, 4  ;;  %s1513_s6 = scalar_lea.hbm %s1773_s28, 6144  ;;  %s1779_s4 = int_to_ptr.vmem [resolvable:$true] %s179_s4 }
  0x12   : > { %p1514_p7 = scmp.ne.s32.totalorder %s1773_s28, %s1513_s6  ;;  %p2030_p8 = pneg %p1775_p6 }
  0x13   : > { %s1518_s9 = scalar_lea.hbm %s2026_s1, 12288  ;;  %p1519_p11 = scmp.lt.u32.totalorder %s1773_s28, %s2026_s1 }
  0x14   : > { %p1516_p9 = pnand %p2030_p8, %p1514_p7  ;;  %p1520_p12 = scmp.lt.u32.totalorder %s1518_s9, %s1513_s6 }
  0x15   : > { %p1522_p0 = scmp.lt.u32.totalorder %s1513_s6, %s1773_s28 }
  0x16   : > { %p1517_p10 = pneg %p1516_p9  ;;  %p1521_p13 = por %p1520_p12, %p1519_p11 }
  0x18   : > { %p1523_p1 = por %p1522_p0, %p1521_p13 }
  0x1a   : > { %p1524_p2 = pnand %p1523_p1, %p1517_p10 }
  0x1c   : > { %1527 = shalt.err (!%p1524_p2)
}
  0x1d   : > { %s1528_s19 = scalar_lea.vmem %s1779_s4, 6144  ;;  %s1687_s20 = smov [#allocation6]  }
  0x1e   : > { %p1529_p3 = scmp.ne.s32.totalorder %s1779_s4, %s1528_s19  ;;  %s1533_s21 = sshll.u32 %s1687_s20, 4  ;;  %s1534_s21 = int_to_ptr.vmem [resolvable:$false] %s1533_s21 }
  0x1f   : > { %s1535_s23 = scalar_lea.vmem %s1534_s21, 12288  ;;  %p1536_p7 = scmp.lt.s32.totalorder %s1779_s4, %s1534_s21 }
  0x20   : > { %p1531_p4 = pnand %p1529_p3, %p2030_p8  ;;  %p1537_p9 = scmp.lt.s32.totalorder %s1535_s23, %s1528_s19 }
  0x22   : > { %p1532_p5 = pneg %p1531_p4  ;;  %p1538_p11 = por %p1537_p9, %p1536_p7 }
  0x24   : > { %p1539_p12 = pnand %p1538_p11, %p1532_p5 }
  0x26   : > { %1542 = shalt.err (!%p1539_p12)
}
  0x27   : > { %s1688_s25 = smov 768   ;;  %s1689_s26 = smov 384  }
  0x28   : > { %s1690_s27 = smov 24   ;;  %s1810_s30 = sadd.s32 4294967295, %s1685_s17  }
  0x29   : > { %1322 = dma.hbm_to_vmem [thread:$0]  (!%p1775_p6), %s1773_s28, 6144, %s1779_s4, %s1781_s5, %s1688_s25, %s1689_s26, %s1690_s27  }
  0x2a   : > { %p76_p10 = scmp.ne.s32.totalorder %s1669_s13, %s1665_s12  ;;  %p2029_p13 = scmp.eq.s32.totalorder %s1810_s30, 0 }
  0x2b   : > { %p1145_p0 = scmp.ge.s32.totalorder %s1685_s17, 1  ;;  %p139_p1 = scmp.lt.s32.totalorder %s1685_s17, 3 }
  0x2c   : > { %p1819_p2 = por %p2029_p13, %p76_p10  ;;  %s1691_s28 = smov [#allocation3]  }
  0x2d   : > { %p1823_p3 = pnand %p1145_p0, %p139_p1  ;;  %s154_s4 = sshll.u32 %s1691_s28, 4  ;;  %s155_s4 = int_to_ptr.vmem [resolvable:$true] %s154_s4 }
  0x2e   : > { %s2036_s6 = scalar_select %p1819_p2, 1, 0 }
  0x2f   : > { %s2037_s7 = scalar_select %p1823_p3, 1, 0 }
  0x30   : > { %p1315_p4 = pneg %p1823_p3  ;;  %s1300_s12 = smul.u32 192, %s170_s22 }
  0x31   : > { %s1240_s9 = smul.u32 3072, %s1681_s16  ;;  %s1543_s23 = scalar_lea.hbm %s2025_s0, 128 }
  0x32   : > { %p1833_p5 = pnand %p1315_p4, %p2029_p13  ;;  %p1544_p7 = scmp.ne.s32.totalorder %s2025_s0, %s1543_s23 }
  0x33   : > { %s1841_s19 = scalar_lea.hbm %s2027_s2, %s1240_s9  ;;  %p1550_p10 = scmp.lt.u32.totalorder %s1543_s23, %s2025_s0 }
  0x34   : > { %p1545_p9 = pneg %p1833_p5 }
  0x36   : > { %p1546_p11 = pnand %p1545_p9, %p1544_p7 }
  0x38   : > { %p1547_p12 = pneg %p1546_p11 }
  0x3a   : > { %p1552_p0 = pnand %p1550_p10, %p1547_p12 }
  0x3c   : > { %1555 = shalt.err (!%p1552_p0)
}
  0x3d   : > { %s1556_s28 = scalar_lea.vmem %s155_s4, 128  ;;  %p1564_p8 = scmp.lt.s32.totalorder %s155_s4, %s155_s4 }
  0x3e   : > { %p1557_p1 = scmp.ne.s32.totalorder %s155_s4, %s1556_s28  ;;  %p1565_p2 = scmp.lt.s32.totalorder %s1556_s28, %s1556_s28 }
  0x40   : > { %p1559_p4 = pnand %p1557_p1, %p1545_p9  ;;  %p1566_p3 = por %p1565_p2, %p1564_p8 }
  0x42   : > { %p1560_p13 = pneg %p1559_p4 }
  0x44   : > { %p1567_p6 = pnand %p1566_p3, %p1560_p13 }
  0x46   : > { %1570 = shalt.err (!%p1567_p6)
}
  0x47   : > { %s1692_s9 = smov 64   ;;  %s1693_s10 = smov 4  }
  0x48   : > { %1318 = dma.hbm_to_vmem [thread:$0]  (!%p1833_p5), %s2025_s0, 128, %s155_s4, [#allocation4], %s1692_s9, %s1692_s9, %s1693_s10  }
  0x49   : > { %s193_s21 = scalar_lea.vmem [#allocation8], %s1300_s12  ;;  %s1571_s25 = scalar_lea.hbm %s1841_s19, 3072 }
  0x4a   : > { %s200_s23 = sshll.u32 %s193_s21, 4  ;;  %p1572_p6 = scmp.ne.s32.totalorder %s1841_s19, %s1571_s25  ;;  %s1862_s23 = int_to_ptr.vmem [resolvable:$true] %s200_s23 }
  0x4b   : > { %p2039_p8 = scmp.ne.s32.totalorder %s2035_s29, 0  ;;  %s1576_s8 = scalar_lea.hbm %s2027_s2, 6144 }
  0x4c   : > { %p1577_p7 = scmp.lt.u32.totalorder %s1841_s19, %s2027_s2  ;;  %p1578_p9 = scmp.lt.u32.totalorder %s1576_s8, %s1571_s25 }
  0x4d   : > { %p2040_p13 = pneg %p2039_p8  ;;  %p1580_p11 = scmp.lt.u32.totalorder %s1571_s25, %s1841_s19 }
  0x4e   : > { %p1579_p5 = por %p1578_p9, %p1577_p7 }
  0x4f   : > { %p1574_p2 = pnand %p1572_p6, %p2040_p13 }
  0x50   : > { %p1581_p12 = por %p1580_p11, %p1579_p5 }
  0x51   : > { %p1575_p3 = pneg %p1574_p2 }
  0x53   : > { %p1582_p10 = pnand %p1581_p12, %p1575_p3 }
  0x55   : > { %1585 = shalt.err (!%p1582_p10)
}
  0x56   : > { %s1586_s4 = scalar_lea.vmem %s1862_s23, 3072  ;;  %p2041_p1 = pmov %p2040_p13 }
  0x57   : > { %p1587_p0 = scmp.ne.s32.totalorder %s1862_s23, %s1586_s4  ;;  %s1694_s12 = smov [#allocation8]  }
  0x58   : > { %s1591_s11 = sshll.u32 %s1694_s12, 4  ;;  %s1592_s11 = int_to_ptr.vmem [resolvable:$false] %s1591_s11 }
  0x59   : > { %p1589_p4 = pnand %p1587_p0, %p2041_p1  ;;  %s1593_s20 = scalar_lea.vmem %s1592_s11, 6144 }
  0x5a   : > { %p1594_p13 = scmp.lt.s32.totalorder %s1862_s23, %s1592_s11  ;;  %p1595_p2 = scmp.lt.s32.totalorder %s1593_s20, %s1586_s4 }
  0x5b   : > { %p1590_p6 = pneg %p1589_p4 }
  0x5c   : > { %p1596_p7 = por %p1595_p2, %p1594_p13 }
  0x5e   : > { %p1597_p9 = pnand %p1596_p7, %p1590_p6 }
  0x60   : > { %1600 = shalt.err (!%p1597_p9)
}
  0x61   : > { %1325 = dma.hbm_to_vmem [thread:$0]  (!%p2039_p8), %s1841_s19, 3072, %s1862_s23, %s1781_s5, %s1692_s9, %s1692_s9, %s1693_s10  }
  0x62   : > { %p2042_p3 = scmp.ne.s32.totalorder %s2037_s7, 0 }
  0x63   : > { %p2043_p5 = scmp.eq.s32.totalorder (!%p2042_p3), %s1810_s30, 0 }
  0x64   : > { %212 = sbr.rel (%p2042_p3) target bundleno = 665 (0x299), region = 32 }
  0x6b   : > { %1652 = dma.done.wait (%p2043_p5), [#allocation4], 128   ;;  %p2044_p11 = pmov %p2043_p5 }
  0x6c   : > { %s218_s29 = sand.u32 1, %s1810_s30   ;;  %s220_s21 = sand.u32 1, %s1669_s13  }
  0x6d   : > { %1654 = vsyncadd (%p2044_p11), [#allocation4], 4294967168  ;;  %s1301_s25 = smul.u32 384, %s220_s21  ;;  %s219_s26 = scalar_lea.sflag [#allocation7], %s218_s29 }
  0x6e   : > { %p2045_p12 = scmp.ne.s32.totalorder %s2036_s6, 0 }
  0x6f   : > { %s1899_s22 = scalar_lea.vmem [#allocation6], %s1301_s25 }
  0x70   : > { %1656 = dma.done.wait (%p2045_p12), %s219_s26, 9216  }
  0x71   : > { %1658 = vsyncadd (%p2045_p12), %s219_s26, 4294958080  ;;  %s1302_s5 = smul.u32 192, %s220_s21  ;;  %p1152_p8 = scmp.ne.s32.totalorder %s1677_s15, 0 }
  0x72   : > { %v1695_v0 = vmov (!%p1152_p8), 0.0  }
  0x73   : > { %s1905_s7 = scalar_lea.vmem [#allocation8], %s1302_s5  ;;  %262 = sbr.rel (%p1152_p8) target bundleno = 122 (0x7a), region = 48  ;;  %263 = vst [vmem:[#allocation2] sm:$0xff] (!%p1152_p8), %v1695_v0  ;;  %264 = vst [vmem:[#allocation2 + $0x8] sm:$0xff] (!%p1152_p8), %v1695_v0 }
  0x7a PF: > { %v1392_v1 = vld [vmem:[%s1899_s22 + $0x4] ss:$24 sps:$4 sm:$0xff]   ;;  %v1696_v3 = vmov 0   ;;  %v1396_v4 = vld [vmem:[%s1899_s22] ss:$24 sps:$4 sm:$0xff]   ;;  %v1697_v54 = vmov 0.0  }
  0x7b   : > { %v1394_v2 = vld [vmem:[%s1899_s22 + $0xc] ss:$24 sps:$4 sm:$0xff]   ;;  %593 = vmatprep.mubr.bf16.mxu0 %v1696_v3  ;;  %636 = vmatprep.mubr.bf16.mxu1 %v1696_v3  ;;  %v1397_v5 = vld [vmem:[%s1899_s22 + $0x8] ss:$24 sps:$4 sm:$0xff]   ;;  %v1400_v7 = vld [vmem:[%s1899_s22 + $0x3c] ss:$24 sps:$4 sm:$0xff]  }
  0x7c   : > { %561 = vmatprep.subr.bf16.mxu0 %v1392_v1  ;;  %604 = vmatprep.subr.bf16.mxu1 %v1394_v2  ;;  %v1398_v6 = vld [vmem:[%s1899_s22 + $0x34] ss:$24 sps:$4 sm:$0xff]   ;;  %v1402_v8 = vld [vmem:[%s1899_s22 + $0x30] ss:$24 sps:$4 sm:$0xff]   ;;  %v1404_v10 = vld [vmem:[%s1899_s22 + $0x64] ss:$24 sps:$4 sm:$0xff]  }
  0x7d   : > { %562 = vmatpush1.bf16.msra.mxu0 %v1396_v4  ;;  %605 = vmatpush1.bf16.msra.mxu1 %v1397_v5  ;;  %v1403_v9 = vld [vmem:[%s1899_s22 + $0x38] ss:$24 sps:$4 sm:$0xff]   ;;  %v1406_v11 = vld [vmem:[%s1899_s22 + $0x6c] ss:$24 sps:$4 sm:$0xff]   ;;  %v1409_v13 = vld [vmem:[%s1899_s22 + $0x68] ss:$24 sps:$4 sm:$0xff]  }
  0x7e   : > { %563 = vmatprep.subr.bf16.mxu0 %v1398_v6  ;;  %606 = vmatprep.subr.bf16.mxu1 %v1400_v7  ;;  %v1408_v12 = vld [vmem:[%s1899_s22 + $0x60] ss:$24 sps:$4 sm:$0xff]   ;;  %v1410_v14 = vld [vmem:[%s1899_s22 + $0x94] ss:$24 sps:$4 sm:$0xff]   ;;  %v1414_v16 = vld [vmem:[%s1899_s22 + $0x90] ss:$24 sps:$4 sm:$0xff]  }
  0x7f   : > { %v1412_v15 = vld [vmem:[%s1899_s22 + $0x9c] ss:$24 sps:$4 sm:$0xff]   ;;  %v1415_v17 = vld [vmem:[%s1899_s22 + $0x98] ss:$24 sps:$4 sm:$0xff]   ;;  %v1418_v19 = vld [vmem:[%s1899_s22 + $0xcc] ss:$24 sps:$4 sm:$0xff]  }
  0x80   : > { %v1416_v18 = vld [vmem:[%s1899_s22 + $0xc4] ss:$24 sps:$4 sm:$0xff]   ;;  %v1420_v20 = vld [vmem:[%s1899_s22 + $0xc0] ss:$24 sps:$4 sm:$0xff]   ;;  %v1422_v22 = vld [vmem:[%s1899_s22 + $0xf4] ss:$24 sps:$4 sm:$0xff]  }
  0x81   : > { %564 = vmatpush1.bf16.msra.mxu0 %v1402_v8  ;;  %607 = vmatpush1.bf16.msra.mxu1 %v1403_v9  ;;  %v1421_v21 = vld [vmem:[%s1899_s22 + $0xc8] ss:$24 sps:$4 sm:$0xff]   ;;  %v1424_v23 = vld [vmem:[%s1899_s22 + $0xfc] ss:$24 sps:$4 sm:$0xff]   ;;  %v1427_v25 = vld [vmem:[%s1899_s22 + $0xf8] ss:$24 sps:$4 sm:$0xff]  }
  0x82   : > { %565 = vmatprep.subr.bf16.mxu0 %v1404_v10  ;;  %608 = vmatprep.subr.bf16.mxu1 %v1406_v11  ;;  %v1426_v24 = vld [vmem:[%s1899_s22 + $0xf0] ss:$24 sps:$4 sm:$0xff]   ;;  %v1428_v26 = vld [vmem:[%s1899_s22 + $0x124] ss:$24 sps:$4 sm:$0xff]   ;;  %v1432_v28 = vld [vmem:[%s1899_s22 + $0x120] ss:$24 sps:$4 sm:$0xff]  }
  0x83   : > { %v1430_v27 = vld [vmem:[%s1899_s22 + $0x12c] ss:$24 sps:$4 sm:$0xff]   ;;  %v1433_v29 = vld [vmem:[%s1899_s22 + $0x128] ss:$24 sps:$4 sm:$0xff]   ;;  %v1436_v31 = vld [vmem:[%s1899_s22 + $0x15c] ss:$24 sps:$4 sm:$0xff]  }
  0x84   : > { %v1434_v30 = vld [vmem:[%s1899_s22 + $0x154] ss:$24 sps:$4 sm:$0xff]   ;;  %v1438_v32 = vld [vmem:[%s1899_s22 + $0x150] ss:$24 sps:$4 sm:$0xff]   ;;  %v1440_v35 = vld [vmem:[#allocation3] sm:$0xff]   ;;  %vm1698_vm0 = vmmov 0  }
  0x85   : > { %566 = vmatpush1.bf16.msra.mxu0 %v1408_v12  ;;  %609 = vmatpush1.bf16.msra.mxu1 %v1409_v13  ;;  %v1439_v33 = vld [vmem:[%s1899_s22 + $0x158] ss:$24 sps:$4 sm:$0xff]   ;;  %v1443_v34 = vld [vmem:[%s1899_s22 + $0x14] ss:$24 sps:$4 sm:$0xff]   ;;  %v1446_v37 = vld [vmem:[%s1899_s22 + $0x44] ss:$24 sps:$4 sm:$0xff]  }
  0x86   : > { %567 = vmatprep.subr.bf16.mxu0 %v1410_v14  ;;  %610 = vmatprep.subr.bf16.mxu1 %v1412_v15  ;;  %v1441_v36 = vld [vmem:[%s1899_s22 + $0x10] ss:$24 sps:$4 sm:$0xff]   ;;  %v1444_v38 = vld [vmem:[%s1899_s22 + $0x40] ss:$24 sps:$4 sm:$0xff]   ;;  %v1449_v39 = vld [vmem:[%s1899_s22 + $0x74] ss:$24 sps:$4 sm:$0xff]  }
  0x87   : > { %v1447_v40 = vld [vmem:[%s1899_s22 + $0x70] ss:$24 sps:$4 sm:$0xff]   ;;  %v1452_v41 = vld [vmem:[%s1899_s22 + $0xa4] ss:$24 sps:$4 sm:$0xff]   ;;  %v1450_v42 = vld [vmem:[%s1899_s22 + $0xa0] ss:$24 sps:$4 sm:$0xff]  }
  0x88   : > { %v1455_v43 = vld [vmem:[%s1899_s22 + $0xd4] ss:$24 sps:$4 sm:$0xff]   ;;  %v1453_v44 = vld [vmem:[%s1899_s22 + $0xd0] ss:$24 sps:$4 sm:$0xff]   ;;  %v1458_v45 = vld [vmem:[%s1899_s22 + $0x104] ss:$24 sps:$4 sm:$0xff]  }
  0x89   : > { %568 = vmatpush1.bf16.msra.mxu0 %v1414_v16  ;;  %611 = vmatpush1.bf16.msra.mxu1 %v1415_v17  ;;  %v1456_v46 = vld [vmem:[%s1899_s22 + $0x100] ss:$24 sps:$4 sm:$0xff]   ;;  %v1461_v47 = vld [vmem:[%s1899_s22 + $0x134] ss:$24 sps:$4 sm:$0xff]   ;;  %v1459_v48 = vld [vmem:[%s1899_s22 + $0x130] ss:$24 sps:$4 sm:$0xff]  }
  0x8a   : > { %569 = vmatprep.subr.bf16.mxu0 %v1416_v18  ;;  %612 = vmatprep.subr.bf16.mxu1 %v1418_v19  ;;  %v1464_v49 = vld [vmem:[%s1899_s22 + $0x164] ss:$24 sps:$4 sm:$0xff]   ;;  %v1462_v50 = vld [vmem:[%s1899_s22 + $0x160] ss:$24 sps:$4 sm:$0xff]   ;;  %v1468_v55 = vld [vmem:[%s1905_s7 + $0x48] sm:$0xff]   ;;  %p1232_p10 = scmp.ne.s32.totalorder %s1677_s15, 1 }
  0x8b   : > { %v1465_v51 = vld [vmem:[%s1905_s7 + $0x40] sm:$0xff]   ;;  %v1469_v56 = vld [vmem:[%s1905_s7 + $0x8] sm:$0xff]   ;;  %v1471_v58 = vld [vmem:[%s1905_s7 + $0x50] sm:$0xff]  }
  0x8c   : > { %v1466_v52 = vld [vmem:[%s1905_s7] sm:$0xff]   ;;  %v1470_v57 = vld [vmem:[%s1905_s7 + $0x88] sm:$0xff]   ;;  %v1472_v59 = vld [vmem:[%s1905_s7 + $0x10] sm:$0xff]  }
  0x8d   : > { %570 = vmatpush1.bf16.msra.mxu0 %v1420_v20  ;;  %613 = vmatpush1.bf16.msra.mxu1 %v1421_v21  ;;  %v1467_v53 = vld [vmem:[%s1905_s7 + $0x80] sm:$0xff]   ;;  %v1473_v60 = vld [vmem:[%s1905_s7 + $0x90] sm:$0xff]   ;;  %v1474_v61 = vld [vmem:[%s1905_s7 + $0x58] sm:$0xff]  }
  0x8e   : > { %571 = vmatprep.subr.bf16.mxu0 %v1422_v22  ;;  %614 = vmatprep.subr.bf16.mxu1 %v1424_v23  ;;  %v1475_v62 = vld [vmem:[%s1905_s7 + $0x18] sm:$0xff]   ;;  %v1477_v0 = vld [vmem:[%s1905_s7 + $0x60] sm:$0xff]   ;;  %v1481_v4 = vld [vmem:[%s1905_s7 + $0x28] sm:$0xff]  }
  0x8f   : > { %v1476_v63 = vld [vmem:[%s1905_s7 + $0x98] sm:$0xff]   ;;  %v1478_v1 = vld [vmem:[%s1905_s7 + $0x20] sm:$0xff]   ;;  %v1482_v5 = vld [vmem:[%s1905_s7 + $0xa8] sm:$0xff]  }
  0x90   : > { %v1479_v2 = vld [vmem:[%s1905_s7 + $0xa0] sm:$0xff]   ;;  %v1483_v6 = vld [vmem:[%s1905_s7 + $0x70] sm:$0xff]   ;;  %v1486_v9 = vld [vmem:[%s1905_s7 + $0x78] sm:$0xff]  }
  0x91   : > { %572 = vmatpush1.bf16.msra.mxu0 %v1426_v24  ;;  %615 = vmatpush1.bf16.msra.mxu1 %v1427_v25  ;;  %v1484_v7 = vld [vmem:[%s1905_s7 + $0x30] sm:$0xff]   ;;  %v1487_v10 = vld [vmem:[%s1905_s7 + $0x38] sm:$0xff]  }
  0x92   : > { %573 = vmatprep.subr.bf16.mxu0 %v1428_v26  ;;  %616 = vmatprep.subr.bf16.mxu1 %v1430_v27  ;;  %v1485_v8 = vld [vmem:[%s1905_s7 + $0xb0] sm:$0xff]   ;;  %v1488_v11 = vld [vmem:[%s1905_s7 + $0xb8] sm:$0xff]  }
  0x95   : > { %574 = vmatpush1.bf16.msra.mxu0 %v1432_v28  ;;  %617 = vmatpush1.bf16.msra.mxu1 %v1433_v29 }
  0x96   : > { %575 = vmatprep.subr.bf16.mxu0 %v1434_v30  ;;  %618 = vmatprep.subr.bf16.mxu1 %v1436_v31 }
  0x99   : > { %576 = vmatpush1.bf16.msra.mxu0 %v1438_v32  ;;  %619 = vmatpush1.bf16.msra.mxu1 %v1439_v33 }
  0x9a   : > { %647 = vmatprep.subr.bf16.mxu0 %v1443_v34  ;;  %1248 = vmatprep.subr.bf16.mxu1 %v1465_v51 }
  0x9c   : > { %594 = vmatmul.mubr.bf16.vlgmr.msra.gmra.mrb[0].mxu0 %v1440_v35  ;;  %637 = vmatmul.mubr.bf16.vlgmr.msra.gmra.mrb[0].mxu1 %v1440_v35 }
  0x9d   : > { %648 = vmatpush1.bf16.msra.mxu0 %v1441_v36  ;;  %679 = vmatprep.mubr.bf16.mxu0 %v1696_v3  ;;  %v1480_v3 = vld [vmem:[%s1905_s7 + $0x68] sm:$0xff]  }
  0x9e   : > { %649 = vmatprep.subr.bf16.mxu0 %v1446_v37  ;;  %1249 = vmatpush3.bf16.msra.mxu1 %v1466_v52 }
  0x9f   : > { %1250 = vmatprep.subr.bf16.mxu1 %v1468_v55 }
  0xa1   : > { %650 = vmatpush1.bf16.msra.mxu0 %v1444_v38 }
  0xa2   : > { %651 = vmatprep.subr.bf16.mxu0 %v1449_v39  ;;  %1251 = vmatpush3.bf16.msra.mxu1 %v1469_v56 }
  0xa3   : > { %1252 = vmatprep.subr.bf16.mxu1 %v1471_v58 }
  0xa5   : > { %652 = vmatpush1.bf16.msra.mxu0 %v1447_v40 }
  0xa6   : > { %653 = vmatprep.subr.bf16.mxu0 %v1452_v41  ;;  %1253 = vmatpush3.bf16.msra.mxu1 %v1472_v59 }
  0xa7   : > { %1254 = vmatprep.subr.bf16.mxu1 %v1474_v61 }
  0xa9   : > { %654 = vmatpush1.bf16.msra.mxu0 %v1450_v42 }
  0xaa   : > { %655 = vmatprep.subr.bf16.mxu0 %v1455_v43  ;;  %1255 = vmatpush3.bf16.msra.mxu1 %v1475_v62 }
  0xab   : > { %1256 = vmatprep.subr.bf16.mxu1 %v1477_v0 }
  0xad   : > { %656 = vmatpush1.bf16.msra.mxu0 %v1453_v44 }
  0xae   : > { %657 = vmatprep.subr.bf16.mxu0 %v1458_v45  ;;  %1257 = vmatpush3.bf16.msra.mxu1 %v1478_v1 }
  0xaf   : > { %1258 = vmatprep.subr.bf16.mxu1 %v1480_v3 }
  0xb1   : > { %658 = vmatpush1.bf16.msra.mxu0 %v1456_v46 }
  0xb2   : > { %659 = vmatprep.subr.bf16.mxu0 %v1461_v47  ;;  %1259 = vmatpush3.bf16.msra.mxu1 %v1481_v4 }
  0xb3   : > { %1260 = vmatprep.subr.bf16.mxu1 %v1483_v6  ;;  %v738_v6 = vld [vmem:[#allocation2] sm:$0xff] }
  0xb5   : > { %660 = vmatpush1.bf16.msra.mxu0 %v1459_v48 }
  0xb6   : > { %661 = vmatprep.subr.bf16.mxu0 %v1464_v49  ;;  %1261 = vmatpush3.bf16.msra.mxu1 %v1484_v7 }
  0xb7   : > { %1262 = vmatprep.subr.bf16.mxu1 %v1486_v9 }
  0xb9   : > { %662 = vmatpush1.bf16.msra.mxu0 %v1462_v50 }
  0xba   : > { %1279 = vmatprep.subr.bf16.mxu0 %v1697_v54  ;;  %1263 = vmatpush3.bf16.msra.mxu1 %v1487_v10 }
  0xbc   : > { %680 = vmatmul.mubr.bf16.vlgmr.msra.gmra.mrb[4].mxu0 %v1440_v35 }
  0xbd   : > { %1280 = vmatpush3.bf16.msra.mxu0 %v1467_v53  ;;  %1295 = vmatprep.mubr.msk.bf16.mxu0 %vm1698_vm0, %v1697_v54 }
  0xbe   : > { %1281 = vmatprep.subr.bf16.mxu0 %v1697_v54 }
  0xc1   : > { %1282 = vmatpush3.bf16.msra.mxu0 %v1470_v57 }
  0xc2   : > { %1283 = vmatprep.subr.bf16.mxu0 %v1697_v54 }
  0xc5   : > { %1284 = vmatpush3.bf16.msra.mxu0 %v1473_v60 }
  0xc6   : > { %1285 = vmatprep.subr.bf16.mxu0 %v1697_v54 }
  0xc9   : > { %1286 = vmatpush3.bf16.msra.mxu0 %v1476_v63 }
  0xca   : > { %1287 = vmatprep.subr.bf16.mxu0 %v1697_v54 }
  0xcd   : > { %1288 = vmatpush3.bf16.msra.mxu0 %v1479_v2 }
  0xce   : > { %1289 = vmatprep.subr.bf16.mxu0 %v1697_v54 }
  0xd1   : > { %1290 = vmatpush3.bf16.msra.mxu0 %v1482_v5 }
  0xd2   : > { %1291 = vmatprep.subr.bf16.mxu0 %v1697_v54 }
  0xd5   : > { %1292 = vmatpush3.bf16.msra.mxu0 %v1485_v8 }
  0xd6   : > { %1293 = vmatprep.subr.bf16.mxu0 %v1697_v54 }
  0xd9   : > { %1294 = vmatpush3.bf16.msra.mxu0 %v1488_v11  ;;  %v739_v11 = vld [vmem:[#allocation2 + $0x8] sm:$0xff] }
 0x16f   : > { %v595_v12 = vpop.f32.mrb[0].mxu0  ;;  %v638_v13 = vpop.f32.mrb[0].mxu1 }
 0x170   : > { %v1202_v14 = vmul.f32 -1.442695, %v595_v12  ;;  %v1204_v15 = vmul.f32 -1.442695, %v638_v13  ;;  %v597_v16 = vpop.f32.mrb[1].mxu0  ;;  %v640_v17 = vpop.f32.mrb[1].mxu1 }
 0x171   : > { %v1203_v18 = vmul.f32 -1.442695, %v597_v16  ;;  %v599_v19 = vpop.f32.mrb[2].mxu0  ;;  %v642_v20 = vpop.f32.mrb[2].mxu1 }
 0x172   : > { %1489 = vpow2.f32 %v1202_v14  ;;  %v1205_v21 = vmul.f32 -1.442695, %v599_v19  ;;  %v1207_v22 = vmul.f32 -1.442695, %v642_v20  ;;  %v601_v23 = vpop.f32.mrb[3].mxu0  ;;  %v644_v24 = vpop.f32.mrb[3].mxu1 }
 0x173   : > { %1491 = vpow2.f32 %v1204_v15  ;;  %v1206_v25 = vmul.f32 -1.442695, %v601_v23 }
 0x174   : > { %1493 = vpow2.f32 %v1203_v18 }
 0x175   : > { %1495 = vpow2.f32 %v1205_v21 }
 0x176   : > { %1497 = vpow2.f32 %v1207_v22 }
 0x177   : > { %1499 = vpow2.f32 %v1206_v25 }
 0x17c   : > { %v1490_v26 = vpop.eup %1489 }
 0x17d   : > { %v1492_v27 = vpop.eup %1491  ;;  %v708_v28 = vadd.f32 1.0, %v1490_v26 }
 0x17e   : > { %v1494_v29 = vpop.eup %1493  ;;  %v710_v30 = vadd.f32 1.0, %v1492_v27 }
 0x17f   : > { %v1496_v31 = vpop.eup %1495  ;;  %1501 = vrcp.f32 %v708_v28  ;;  %v709_v32 = vadd.f32 1.0, %v1494_v29 }
 0x180   : > { %v1498_v33 = vpop.eup %1497  ;;  %1503 = vrcp.f32 %v710_v30  ;;  %v711_v34 = vadd.f32 1.0, %v1496_v31 }
 0x181   : > { %v1500_v35 = vpop.eup %1499  ;;  %1505 = vrcp.f32 %v709_v32  ;;  %v713_v36 = vadd.f32 1.0, %v1498_v33 }
 0x182   : > { %1507 = vrcp.f32 %v711_v34  ;;  %v712_v37 = vadd.f32 1.0, %v1500_v35 }
 0x183   : > { %1509 = vrcp.f32 %v713_v36 }
 0x184   : > { %1511 = vrcp.f32 %v712_v37 }
 0x189   : > { %v1502_v38 = vpop.eup %1501 }
 0x18a   : > { %v1504_v39 = vpop.eup %1503  ;;  %v726_v40 = vmul.f32 %v1502_v38, %v595_v12 }
 0x18b   : > { %v1506_v41 = vpop.eup %1505  ;;  %v728_v48 = vmul.f32 %v1504_v39, %v638_v13 }
 0x18c   : > { %v1508_v42 = vpop.eup %1507  ;;  %v732_v43 = vmul.f32 %v726_v40, %v640_v17  ;;  %v727_v47 = vmul.f32 %v1506_v41, %v597_v16 }
 0x18d   : > { %v1510_v44 = vpop.eup %1509  ;;  %v729_v45 = vmul.f32 %v1508_v42, %v599_v19 }
 0x18e   : > { %v1512_v46 = vpop.eup %1511  ;;  %v731_v54 = vmul.f32 %v1510_v44, %v642_v20 }
 0x18f   : > { %v735_v49 = vmul.f32 %v729_v45, %v644_v24  ;;  %v681_v50 = vpop.f32.mrb[4].mxu0  ;;  %v730_v51 = vmul.f32 %v1512_v46, %v601_v23 }
 0x190   : > { %v733_v52 = vmul.f32 %v727_v47, %v681_v50  ;;  %v683_v53 = vpop.f32.mrb[5].mxu0 }
 0x191   : > { %v740_v55 = vpack.c.bf16 %v735_v49, %v732_v43  ;;  %v734_v56 = vmul.f32 %v728_v48, %v683_v53  ;;  %v685_v57 = vpop.f32.mrb[6].mxu0 }
 0x192   : > { %v736_v58 = vmul.f32 %v730_v51, %v685_v57  ;;  %v687_v59 = vpop.f32.mrb[7].mxu0 }
 0x193   : > { %v737_v60 = vmul.f32 %v731_v54, %v687_v59 }
 0x194   : > { %v741_v61 = vpack.c.bf16 %v736_v58, %v733_v52 }
 0x195   : > { %v742_v62 = vpack.c.bf16 %v737_v60, %v734_v56 }
 0x196   : > { %967 = vmatprep.mubr.bf16.mxu1 %v741_v61 }
 0x197   : > { %968 = vmatmul.mubr.bf16.vlgmr.msra.gmra.mrb[4].mxu1 %v740_v55  ;;  %1296 = vmatmul.mubr.bf16.vlgmr.msra.gmra.mrb[8].mxu0 %v742_v62 }
 0x26a   : > { %v1264_v63 = vpop.f32.mrb[4].mxu1  ;;  %v1010_v0 = vpop.f32.mrb[8].mxu0 }
 0x26b   : > { %v1265_v1 = vpop.f32.mrb[5].mxu1  ;;  %v1297_v2 = vpop.f32.mrb[9].mxu0 }
 0x26c   : > { %v1266_v3 = vadd.f32 %v1265_v1, %v1264_v63  ;;  %v1267_v4 = vpop.f32.mrb[6].mxu1  ;;  %v1013_v5 = vpop.f32.mrb[10].mxu0 }
 0x26d   : > { %v1268_v7 = vpop.f32.mrb[7].mxu1  ;;  %v1298_v8 = vpop.f32.mrb[11].mxu0 }
 0x26e   : > { %v1011_v9 = vadd.f32 %v1266_v3, %v1010_v0  ;;  %v1269_v10 = vadd.f32 %v1268_v7, %v1267_v4  ;;  %1024 = sbr.rel (%p1232_p10) target bundleno = 639 (0x27f), region = 52 }
 0x270   : > { %v1017_v12 = vadd.f32 %v1011_v9, %v738_v6  ;;  %v1014_v13 = vadd.f32 %v1269_v10, %v1013_v5 }
 0x272   : > { %1019 = vst [vmem:[#allocation2] sm:$0xff] %v1017_v12  ;;  %v1018_v14 = vadd.f32 %v1014_v13, %v739_v11 }
 0x274   : > { %1020 = vst [vmem:[#allocation2 + $0x8] sm:$0xff] %v1018_v14 }
 0x279   : > { %v1025_v15 = vld [vmem:[#allocation2] sm:$0xff] }
 0x27b   : > { %v1026_v16 = vld [vmem:[#allocation2 + $0x8] sm:$0xff] }
 0x27c   : > { %v1246_v17 = vpack.c.bf16 %v1026_v16, %v1025_v15 }
 0x27e   : > { %1247 = vst [vmem:[#allocation9] sm:$0xff] %v1246_v17  }
 0x27f PF: > { %p1329_p0 = scmp.eq.s32.totalorder %s1810_s30, 1  ;;  %s1699_s6 = smov [#allocation9]  }
 0x280   : > { %s1046_s19 = sshll.u32 %s1699_s6, 4  ;;  %s1047_s19 = int_to_ptr.vmem [resolvable:$true] %s1046_s19 }
 0x281   : > { %s1601_s9 = scalar_lea.vmem %s1047_s19, 128  ;;  %p1608_p13 = scmp.lt.s32.totalorder %s1047_s19, %s1047_s19 }
 0x282   : > { %p1602_p1 = scmp.ne.s32.totalorder %s1047_s19, %s1601_s9  ;;  %p1609_p2 = scmp.lt.s32.totalorder %s1601_s9, %s1601_s9 }
 0x284   : > { %p1603_p4 = pnand %p1602_p1, %p1329_p0  ;;  %p1610_p7 = por %p1609_p2, %p1608_p13 }
 0x286   : > { %p1604_p6 = pneg %p1603_p4 }
 0x288   : > { %p1611_p9 = pnand %p1610_p7, %p1604_p6 }
 0x28a   : > { %1614 = shalt.err (!%p1611_p9)
}
 0x28b   : > { %s1615_s23 = scalar_lea.hbm %s2028_s3, 128 }
 0x28c   : > { %p1616_p3 = scmp.ne.s32.totalorder %s2028_s3, %s1615_s23  ;;  %p1621_p12 = scmp.lt.u32.totalorder %s1615_s23, %s2028_s3 }
 0x28e   : > { %p1617_p5 = pnand %p1616_p3, %p1329_p0 }
 0x290   : > { %p1618_p11 = pneg %p1617_p5 }
 0x292   : > { %p1623_p8 = pnand %p1621_p12, %p1618_p11 }
 0x294   : > { %1626 = shalt.err (!%p1623_p8)
}
 0x295   : > { %s1700_s12 = smov 64   ;;  %s1701_s11 = smov 4  }
 0x296   : > { %1312 = dma.vmem_to_hbm [thread:$0]  (%p1329_p0), %s1047_s19, 128, %s2028_s3, [#allocation5], %s1700_s12, %s1700_s12, %s1701_s11  }
 0x297   : > { %1660 = dma.done.wait (%p1329_p0), [#allocation5], 128  }
 0x298   : > { %1662 = vsyncadd (%p1329_p0), [#allocation5], 4294967168 }
 0x299 PF: > { %s18_s17 = sadd.s32 1, %s1685_s17   ;;  %s2046_s12 = smov %s1669_s13 }
 0x29a   : > { %p15_p10 = scmp.ge.s32.totalorder %s18_s17, 4   ;;  %s2047_s13 = smov %s1673_s14 }
 0x29b   : > { %s2048_s14 = smov %s1766_s24  ;;  %s2049_s15 = smov %s1681_s16 }
 0x29c   : > { %s2050_s16 = smov %s2052_s18  ;;  %17 = sbr.rel (!%p15_p10) target bundleno = 6 (0x6), region = 95 }
 0x2a3   :  { %1062 = vsyncpa [#allocation4], 1 }
 0x2a4   :  { %1064 = vsyncpa [#allocation4 + $0x1], 1 }
 0x2a5   :  { %1065 = vsyncpa [#allocation7], 1 }
 0x2a6   :  { %1067 = vsyncpa [#allocation7 + $0x1], 1 }
 0x2a7   :  { %1068 = vsyncpa [#allocation5], 1 }
 0x2a8   :  { %1070 = vsyncpa [#allocation5 + $0x1], 1 }

</bundles_post_ra>
